<compile_context>
chip_gen: v7x
topology: tpu7x:2x2x1
jax: 0.10.0
libtpu: 0.0.40
codegen_flags: <defaults>
</compile_context>

<pallas_src>
import functools

import jax
import jax.numpy as jnp
from jax import lax
from jax.experimental import pallas as pl
from jax.experimental.pallas import tpu as pltpu

ALPHA = 0.7
BETA = 0.3
GAMMA = 4.0 / 3.0
SMOOTH = 1.0
LANE = 128
TS_MAX = 512  # sublane tile: 512 * 128 = 65536 pixels per grid step


def _neo_loss_kernel(y_ref, m_ref, out_ref,
                     acc_bce, acc_ce, acc_tp, acc_p, acc_t,
                     *, C, TS, n_valid, n_total, needs_mask):
    nj = pl.num_programs(1)
    step = pl.program_id(0) * nj + pl.program_id(1)
    last = pl.num_programs(0) * nj - 1

    @pl.when(step == 0)
    def _init():
        acc_bce[...] = jnp.zeros_like(acc_bce)
        acc_ce[...] = jnp.zeros_like(acc_ce)
        acc_tp[...] = jnp.zeros_like(acc_tp)
        acc_p[...] = jnp.zeros_like(acc_p)
        acc_t[...] = jnp.zeros_like(acc_t)

    x = y_ref[...].astype(jnp.float32)   # (C, TS, 128) logits
    t = m_ref[...].astype(jnp.float32)   # (C, TS, 128) targets

    # ---- aux loss: BCE-with-logits on polyp_pr vs polyp_mask -------------------
    neo = x[0]
    non = x[1]
    z = jnp.where(neo > non, neo, 0.0) + jnp.where(non > neo, non, 0.0)
    polyp_t = t[0] + t[1]
    bce = jnp.maximum(z, 0.0) - z * polyp_t + jnp.log1p(jnp.exp(-jnp.abs(z)))

    # ---- main CE: cross_entropy(y_pr, argmax(mask, channel)) -------------------
    m = jnp.max(x, axis=0)                                   # (TS, 128)
    ex = jnp.exp(x - m)                                      # (C, TS, 128)
    se = jnp.sum(ex, axis=0)                                 # (TS, 128)
    lse = m + jnp.log(se)                                    # (TS, 128)

    iota_c = lax.broadcasted_iota(jnp.int32, (C, TS, LANE), 0)
    tmax = jnp.max(t, axis=0)                                # (TS, 128)
    # first index achieving the max (torch.argmax tie-breaking: first occurrence)
    first_idx = jnp.min(jnp.where(t == tmax, iota_c, C), axis=0)
    onehot = (iota_c == first_idx).astype(jnp.float32)       # (C, TS, 128)
    picked = jnp.sum(x * onehot, axis=0)                     # (TS, 128)
    ce = lse - picked

    # ---- softmax (reciprocal on the EUP slot) -----------------------------------
    p = ex * pl.reciprocal(se, approx=False)                 # (C, TS, 128)

    if needs_mask:
        j = pl.program_id(1)
        sub = lax.broadcasted_iota(jnp.int32, (TS, LANE), 0)
        lane = lax.broadcasted_iota(jnp.int32, (TS, LANE), 1)
        pix = j * (TS * LANE) + sub * LANE + lane
        valid = (pix < n_valid).astype(jnp.float32)
        bce = bce * valid
        ce = ce * valid
        p = p * valid                                        # targets are zero-padded

    # ---- lane-preserving accumulation (cross-lane reduce deferred to finalize) --
    acc_bce[...] += jnp.sum(bce, axis=0, keepdims=True)      # (1, 128)
    acc_ce[...] += jnp.sum(ce, axis=0, keepdims=True)        # (1, 128)
    acc_tp[...] += jnp.sum(p * t, axis=1)                    # (C, 128)
    acc_p[...] += jnp.sum(p, axis=1)                         # (C, 128)
    acc_t[...] += jnp.sum(t, axis=1)                         # (C, 128)

    @pl.when(step == last)
    def _finalize():
        tp = jnp.sum(acc_tp[...], axis=1, keepdims=True)     # (C, 1)
        sp = jnp.sum(acc_p[...], axis=1, keepdims=True)
        st = jnp.sum(acc_t[...], axis=1, keepdims=True)
        fp = sp - tp
        fn = st - tp
        score = (tp + SMOOTH) / (tp + ALPHA * fp + BETA * fn + SMOOTH)
        ftl = (1.0 - score) ** GAMMA                         # (C, 1)
        ft_loss = jnp.sum(ftl, axis=0, keepdims=True) / float(C)
        aux_loss = jnp.sum(acc_bce[...], axis=1, keepdims=True) / n_total
        ce_loss = jnp.sum(acc_ce[...], axis=1, keepdims=True) / n_total
        out_ref[...] = ce_loss + ft_loss + aux_loss          # (1, 1)


def neo_loss(y_pr, mask):
    """y_pr, mask: NCHW float arrays with the same channel count C >= 2."""
    B, C, H, W = y_pr.shape
    assert mask.shape == y_pr.shape
    npix = H * W

    # Choose a lane-dense tile (TS, 128): TS multiple of 8 (or full extent).
    np_raw = pl.cdiv(npix, LANE)
    if np_raw <= TS_MAX:
        ts = np_raw                      # full extent -> no divisibility constraint
        np_rows = np_raw
    else:
        ts = TS_MAX                      # multiple of 8
        np_rows = pl.cdiv(np_raw, ts) * ts
    npad = np_rows * LANE
    needs_mask = (npad != npix)

    # Copy-free reshape (no transpose, no dtype cast): (B, C, H, W) -> (B, C, NP, 128)
    y2 = y_pr.reshape(B, C, npix)
    m2 = mask.reshape(B, C, npix)
    if needs_mask:
        pad = npad - npix
        y2 = jnp.pad(y2, ((0, 0), (0, 0), (0, pad)))
        m2 = jnp.pad(m2, ((0, 0), (0, 0), (0, pad)))
    y2 = y2.reshape(B, C, np_rows, LANE)
    m2 = m2.reshape(B, C, np_rows, LANE)

    grid = (B, np_rows // ts)
    kernel = functools.partial(_neo_loss_kernel, C=C, TS=ts,
                               n_valid=npix, n_total=float(B * H * W),
                               needs_mask=needs_mask)

    in_spec = pl.BlockSpec((None, C, ts, LANE), lambda b, j: (b, 0, j, 0))

    out = pl.pallas_call(
        kernel,
        out_shape=jax.ShapeDtypeStruct((1, 1), jnp.float32),
        grid_spec=pltpu.PrefetchScalarGridSpec(
            num_scalar_prefetch=0,
            grid=grid,
            in_specs=[in_spec, in_spec],
            out_specs=pl.BlockSpec((1, 1), lambda b, j: (0, 0)),
            scratch_shapes=[
                pltpu.VMEM((1, LANE), jnp.float32),   # per-lane BCE partial (aux)
                pltpu.VMEM((1, LANE), jnp.float32),   # per-lane CE partial
                pltpu.VMEM((C, LANE), jnp.float32),   # per-lane tp partial
                pltpu.VMEM((C, LANE), jnp.float32),   # per-lane softmax-sum partial
                pltpu.VMEM((C, LANE), jnp.float32),   # per-lane target-sum partial
            ],
        ),
        compiler_params=pltpu.CompilerParams(
            dimension_semantics=("arbitrary", "arbitrary"),
            vmem_limit_bytes=32 * 1024 * 1024),
    )(y2, m2)
    return out[0, 0]


def neo_loss_ref(y_pr, mask):
    """Pure-JAX reference mirroring the PyTorch forward."""
    neo = y_pr[:, 0:1]
    non = y_pr[:, 1:2]
    polyp_pr = jnp.where(neo > non, neo, 0.0) + jnp.where(non > neo, non, 0.0)
    polyp_mask = mask[:, 0:1] + mask[:, 1:2]
    z = polyp_pr
    bce = jnp.maximum(z, 0.0) - z * polyp_mask + jnp.log1p(jnp.exp(-jnp.abs(z)))
    aux_loss = bce.mean()

    cls = jnp.argmax(mask, axis=1)                               # (B, H, W)
    lse = jax.scipy.special.logsumexp(y_pr, axis=1)              # (B, H, W)
    picked = jnp.take_along_axis(y_pr, cls[:, None], axis=1)[:, 0]
    ce_loss = (lse - picked).mean()

    p = jax.nn.softmax(y_pr, axis=1)
    tp = (p * mask).sum(axis=(0, 2, 3))
    fp = p.sum(axis=(0, 2, 3)) - tp
    fn = mask.sum(axis=(0, 2, 3)) - tp
    score = (tp + SMOOTH) / (tp + ALPHA * fp + BETA * fn + SMOOTH)
    ft_loss = ((1.0 - score) ** GAMMA).mean()

    return ce_loss + ft_loss + aux_loss


if __name__ == "__main__":
    key = jax.random.PRNGKey(0)
    k1, k2 = jax.random.split(key)

    B, C, H, W = 2, 3, 16, 16
    y_pr = jax.random.normal(k1, (B, C, H, W), dtype=jnp.float32)
    # one-hot-style target mask over 3 channels
    cls = jax.random.randint(k2, (B, H, W), 0, C)
    mask = jax.nn.one_hot(cls, C, dtype=jnp.float32)             # (B, H, W, C)
    mask = jnp.transpose(mask, (0, 3, 1, 2))                     # NCHW

    loss = jax.block_until_ready(neo_loss(y_pr, mask))
    ref = jax.block_until_ready(neo_loss_ref(y_pr, mask))

    assert jnp.allclose(loss, ref, atol=1e-5, rtol=1e-5), (loss, ref)
    print("KERNEL_OK")
</pallas_src>

<mosaic_0001>
module attributes {stable_mosaic.version = 11 : i64} {
  func.func @_neo_loss_kernel(%arg0: i32, %arg1: i32, %arg2: memref<1x3x2x128xf32, #tpu.memory_space<vmem>>, %arg3: memref<1x3x2x128xf32, #tpu.memory_space<vmem>>, %arg4: memref<1x1xf32, #tpu.memory_space<vmem>>, %arg5: memref<1x128xf32, #tpu.memory_space<vmem>>, %arg6: memref<1x128xf32, #tpu.memory_space<vmem>>, %arg7: memref<3x128xf32, #tpu.memory_space<vmem>>, %arg8: memref<3x128xf32, #tpu.memory_space<vmem>>, %arg9: memref<3x128xf32, #tpu.memory_space<vmem>>) attributes {dimension_semantics = [#tpu.dimension_semantics<arbitrary>, #tpu.dimension_semantics<arbitrary>], iteration_bounds = array<i64: 2, 1>, scalar_prefetch = 0 : i64, scratch_operands = 5 : i64, tpu.core_type = #tpu.core_type<tc>, window_params = [{transform_indices = @transform_0, window_bounds = array<i64: 1, 3, 2, 128>}, {transform_indices = @transform_1, window_bounds = array<i64: 1, 3, 2, 128>}, {pipeline_mode = #tpu.pipeline_mode<synchronous>, transform_indices = @transform_2, window_bounds = array<i64: 1, 1>}]} {
    %c1_i32 = arith.constant 1 : i32
    %0 = arith.muli %arg0, %c1_i32 : i32
    %1 = arith.addi %0, %arg1 : i32
    %c0_i32 = arith.constant 0 : i32
    %2 = arith.cmpi eq, %1, %c0_i32 : i32
    %3 = arith.extui %2 : i1 to i32
    %c0_i32_0 = arith.constant 0 : i32
    %4 = arith.cmpi ne, %3, %c0_i32_0 : i32
    scf.if %4 {
      %cst_43 = arith.constant 0.000000e+00 : f32
      %89 = vector.broadcast %cst_43 : f32 to vector<1x128xf32>
      %c0_44 = arith.constant 0 : index
      %c0_45 = arith.constant 0 : index
      %90 = vector.load %arg5[%c0_44, %c0_45] : memref<1x128xf32, #tpu.memory_space<vmem>>, vector<1x128xf32>
      tpu.vector_store %arg5[%c0_44, %c0_45], %89 {strides = array<i32>} : memref<1x128xf32, #tpu.memory_space<vmem>>, vector<1x128xf32>,
      %cst_46 = arith.constant 0.000000e+00 : f32
      %91 = vector.broadcast %cst_46 : f32 to vector<1x128xf32>
      %c0_47 = arith.constant 0 : index
      %c0_48 = arith.constant 0 : index
      %92 = vector.load %arg6[%c0_47, %c0_48] : memref<1x128xf32, #tpu.memory_space<vmem>>, vector<1x128xf32>
      tpu.vector_store %arg6[%c0_47, %c0_48], %91 {strides = array<i32>} : memref<1x128xf32, #tpu.memory_space<vmem>>, vector<1x128xf32>,
      %cst_49 = arith.constant 0.000000e+00 : f32
      %93 = vector.broadcast %cst_49 : f32 to vector<3x128xf32>
      %c0_50 = arith.constant 0 : index
      %c0_51 = arith.constant 0 : index
      %94 = vector.load %arg7[%c0_50, %c0_51] : memref<3x128xf32, #tpu.memory_space<vmem>>, vector<3x128xf32>
      tpu.vector_store %arg7[%c0_50, %c0_51], %93 {strides = array<i32>} : memref<3x128xf32, #tpu.memory_space<vmem>>, vector<3x128xf32>,
      %cst_52 = arith.constant 0.000000e+00 : f32
      %95 = vector.broadcast %cst_52 : f32 to vector<3x128xf32>
      %c0_53 = arith.constant 0 : index
      %c0_54 = arith.constant 0 : index
      %96 = vector.load %arg8[%c0_53, %c0_54] : memref<3x128xf32, #tpu.memory_space<vmem>>, vector<3x128xf32>
      tpu.vector_store %arg8[%c0_53, %c0_54], %95 {strides = array<i32>} : memref<3x128xf32, #tpu.memory_space<vmem>>, vector<3x128xf32>,
      %cst_55 = arith.constant 0.000000e+00 : f32
      %97 = vector.broadcast %cst_55 : f32 to vector<3x128xf32>
      %c0_56 = arith.constant 0 : index
      %c0_57 = arith.constant 0 : index
      %98 = vector.load %arg9[%c0_56, %c0_57] : memref<3x128xf32, #tpu.memory_space<vmem>>, vector<3x128xf32>
      tpu.vector_store %arg9[%c0_56, %c0_57], %97 {strides = array<i32>} : memref<3x128xf32, #tpu.memory_space<vmem>>, vector<3x128xf32>,
    } else {
    }
    %c0 = arith.constant 0 : index
    %c0_1 = arith.constant 0 : index
    %c0_2 = arith.constant 0 : index
    %c0_3 = arith.constant 0 : index
    %5 = vector.load %arg2[%c0, %c0_1, %c0_2, %c0_3] : memref<1x3x2x128xf32, #tpu.memory_space<vmem>>, vector<1x3x2x128xf32>
    %6 = vector.shape_cast %5 : vector<1x3x2x128xf32> to vector<3x2x128xf32>
    %c0_4 = arith.constant 0 : index
    %c0_5 = arith.constant 0 : index
    %c0_6 = arith.constant 0 : index
    %c0_7 = arith.constant 0 : index
    %7 = vector.load %arg3[%c0_4, %c0_5, %c0_6, %c0_7] : memref<1x3x2x128xf32, #tpu.memory_space<vmem>>, vector<1x3x2x128xf32>
    %8 = vector.shape_cast %7 : vector<1x3x2x128xf32> to vector<3x2x128xf32>
    %9 = vector.extract_strided_slice %6 {offsets = [0, 0, 0], sizes = [1, 2, 128], strides = [1, 1, 1]} : vector<3x2x128xf32> to vector<1x2x128xf32>
    %10 = vector.shape_cast %9 : vector<1x2x128xf32> to vector<2x128xf32>
    %11 = vector.extract_strided_slice %6 {offsets = [1, 0, 0], sizes = [1, 2, 128], strides = [1, 1, 1]} : vector<3x2x128xf32> to vector<1x2x128xf32>
    %12 = vector.shape_cast %11 : vector<1x2x128xf32> to vector<2x128xf32>
    %13 = arith.cmpf ogt, %10, %12 : vector<2x128xf32>
    %cst = arith.constant 0.000000e+00 : f32
    %14 = vector.broadcast %cst : f32 to vector<2x128xf32>
    %15 = arith.select %13, %10, %14 : vector<2x128xi1>, vector<2x128xf32>
    %16 = arith.cmpf ogt, %12, %10 : vector<2x128xf32>
    %cst_8 = arith.constant 0.000000e+00 : f32
    %17 = vector.broadcast %cst_8 : f32 to vector<2x128xf32>
    %18 = arith.select %16, %12, %17 : vector<2x128xi1>, vector<2x128xf32>
    %19 = arith.addf %15, %18 : vector<2x128xf32>
    %20 = vector.extract_strided_slice %8 {offsets = [0, 0, 0], sizes = [1, 2, 128], strides = [1, 1, 1]} : vector<3x2x128xf32> to vector<1x2x128xf32>
    %21 = vector.shape_cast %20 : vector<1x2x128xf32> to vector<2x128xf32>
    %22 = vector.extract_strided_slice %8 {offsets = [1, 0, 0], sizes = [1, 2, 128], strides = [1, 1, 1]} : vector<3x2x128xf32> to vector<1x2x128xf32>
    %23 = vector.shape_cast %22 : vector<1x2x128xf32> to vector<2x128xf32>
    %24 = arith.addf %21, %23 : vector<2x128xf32>
    %cst_9 = arith.constant 0.000000e+00 : f32
    %25 = vector.broadcast %cst_9 : f32 to vector<2x128xf32>
    %26 = arith.maximumf %19, %25 : vector<2x128xf32>
    %27 = arith.mulf %19, %24 : vector<2x128xf32>
    %28 = arith.subf %26, %27 : vector<2x128xf32>
    %29 = math.absf %19 : vector<2x128xf32>
    %cst_10 = arith.constant 0.000000e+00 : f32
    %30 = vector.broadcast %cst_10 : f32 to vector<2x128xf32>
    %31 = arith.subf %30, %29 : vector<2x128xf32>
    %32 = math.exp %31 : vector<2x128xf32>
    %33 = math.log1p %32 : vector<2x128xf32>
    %34 = arith.addf %28, %33 : vector<2x128xf32>
    %cst_11 = arith.constant dense<0xFF800000> : vector<2x128xf32>
    %35 = vector.multi_reduction <maximumf>, %6, %cst_11 [0] : vector<3x2x128xf32> to vector<2x128xf32>
    %36 = vector.shape_cast %35 : vector<2x128xf32> to vector<1x2x128xf32>
    %37 = vector.broadcast %36 : vector<1x2x128xf32> to vector<3x2x128xf32>
    %38 = arith.subf %6, %37 : vector<3x2x128xf32>
    %39 = math.exp %38 : vector<3x2x128xf32>
    %cst_12 = arith.constant dense<0.000000e+00> : vector<2x128xf32>
    %40 = vector.multi_reduction <add>, %39, %cst_12 [0] : vector<3x2x128xf32> to vector<2x128xf32>
    %41 = math.log %40 : vector<2x128xf32>
    %42 = arith.addf %35, %41 : vector<2x128xf32>
    %43 = tpu.iota {dimensions = array<i32: 0>} : vector<3x2x128xi32>
    %cst_13 = arith.constant dense<0xFF800000> : vector<2x128xf32>
    %44 = vector.multi_reduction <maximumf>, %8, %cst_13 [0] : vector<3x2x128xf32> to vector<2x128xf32>
    %45 = vector.shape_cast %44 : vector<2x128xf32> to vector<1x2x128xf32>
    %46 = vector.broadcast %45 : vector<1x2x128xf32> to vector<3x2x128xf32>
    %47 = arith.cmpf oeq, %8, %46 : vector<3x2x128xf32>
    %c3_i32 = arith.constant 3 : i32
    %48 = vector.broadcast %c3_i32 : i32 to vector<3x2x128xi32>
    %49 = arith.select %47, %43, %48 : vector<3x2x128xi1>, vector<3x2x128xi32>
    %cst_14 = arith.constant dense<2147483647> : vector<2x128xi32>
    %50 = vector.multi_reduction <minsi>, %49, %cst_14 [0] : vector<3x2x128xi32> to vector<2x128xi32>
    %51 = vector.shape_cast %50 : vector<2x128xi32> to vector<1x2x128xi32>
    %52 = vector.broadcast %51 : vector<1x2x128xi32> to vector<3x2x128xi32>
    %53 = arith.cmpi eq, %43, %52 : vector<3x2x128xi32>
    %54 = arith.extui %53 : vector<3x2x128xi1> to vector<3x2x128xi32>
    %55 = arith.sitofp %54 : vector<3x2x128xi32> to vector<3x2x128xf32>
    %56 = arith.mulf %6, %55 : vector<3x2x128xf32>
    %cst_15 = arith.constant dense<0.000000e+00> : vector<2x128xf32>
    %57 = vector.multi_reduction <add>, %56, %cst_15 [0] : vector<3x2x128xf32> to vector<2x128xf32>
    %58 = arith.subf %42, %57 : vector<2x128xf32>
    %59 = tpu.reciprocal %40 : vector<2x128xf32> -> vector<2x128xf32>
    %60 = vector.shape_cast %59 : vector<2x128xf32> to vector<1x2x128xf32>
    %61 = vector.broadcast %60 : vector<1x2x128xf32> to vector<3x2x128xf32>
    %62 = arith.mulf %39, %61 : vector<3x2x128xf32>
    %c0_16 = arith.constant 0 : index
    %c0_17 = arith.constant 0 : index
    %63 = vector.load %arg5[%c0_16, %c0_17] : memref<1x128xf32, #tpu.memory_space<vmem>>, vector<1x128xf32>
    %cst_18 = arith.constant dense<0.000000e+00> : vector<128xf32>
    %64 = vector.multi_reduction <add>, %34, %cst_18 [0] : vector<2x128xf32> to vector<128xf32>
    %65 = vector.shape_cast %64 : vector<128xf32> to vector<1x128xf32>
    %66 = arith.addf %63, %65 : vector<1x128xf32>
    %c0_19 = arith.constant 0 : index
    %c0_20 = arith.constant 0 : index
    %67 = vector.load %arg5[%c0_19, %c0_20] : memref<1x128xf32, #tpu.memory_space<vmem>>, vector<1x128xf32>
    tpu.vector_store %arg5[%c0_19, %c0_20], %66 {strides = array<i32>} : memref<1x128xf32, #tpu.memory_space<vmem>>, vector<1x128xf32>,
    %c0_21 = arith.constant 0 : index
    %c0_22 = arith.constant 0 : index
    %68 = vector.load %arg6[%c0_21, %c0_22] : memref<1x128xf32, #tpu.memory_space<vmem>>, vector<1x128xf32>
    %cst_23 = arith.constant dense<0.000000e+00> : vector<128xf32>
    %69 = vector.multi_reduction <add>, %58, %cst_23 [0] : vector<2x128xf32> to vector<128xf32>
    %70 = vector.shape_cast %69 : vector<128xf32> to vector<1x128xf32>
    %71 = arith.addf %68, %70 : vector<1x128xf32>
    %c0_24 = arith.constant 0 : index
    %c0_25 = arith.constant 0 : index
    %72 = vector.load %arg6[%c0_24, %c0_25] : memref<1x128xf32, #tpu.memory_space<vmem>>, vector<1x128xf32>
    tpu.vector_store %arg6[%c0_24, %c0_25], %71 {strides = array<i32>} : memref<1x128xf32, #tpu.memory_space<vmem>>, vector<1x128xf32>,
    %c0_26 = arith.constant 0 : index
    %c0_27 = arith.constant 0 : index
    %73 = vector.load %arg7[%c0_26, %c0_27] : memref<3x128xf32, #tpu.memory_space<vmem>>, vector<3x128xf32>
    %74 = arith.mulf %62, %8 : vector<3x2x128xf32>
    %cst_28 = arith.constant dense<0.000000e+00> : vector<3x128xf32>
    %75 = vector.multi_reduction <add>, %74, %cst_28 [1] : vector<3x2x128xf32> to vector<3x128xf32>
    %76 = arith.addf %73, %75 : vector<3x128xf32>
    %c0_29 = arith.constant 0 : index
    %c0_30 = arith.constant 0 : index
    %77 = vector.load %arg7[%c0_29, %c0_30] : memref<3x128xf32, #tpu.memory_space<vmem>>, vector<3x128xf32>
    tpu.vector_store %arg7[%c0_29, %c0_30], %76 {strides = array<i32>} : memref<3x128xf32, #tpu.memory_space<vmem>>, vector<3x128xf32>,
    %c0_31 = arith.constant 0 : index
    %c0_32 = arith.constant 0 : index
    %78 = vector.load %arg8[%c0_31, %c0_32] : memref<3x128xf32, #tpu.memory_space<vmem>>, vector<3x128xf32>
    %cst_33 = arith.constant dense<0.000000e+00> : vector<3x128xf32>
    %79 = vector.multi_reduction <add>, %62, %cst_33 [1] : vector<3x2x128xf32> to vector<3x128xf32>
    %80 = arith.addf %78, %79 : vector<3x128xf32>
    %c0_34 = arith.constant 0 : index
    %c0_35 = arith.constant 0 : index
    %81 = vector.load %arg8[%c0_34, %c0_35] : memref<3x128xf32, #tpu.memory_space<vmem>>, vector<3x128xf32>
    tpu.vector_store %arg8[%c0_34, %c0_35], %80 {strides = array<i32>} : memref<3x128xf32, #tpu.memory_space<vmem>>, vector<3x128xf32>,
    %c0_36 = arith.constant 0 : index
    %c0_37 = arith.constant 0 : index
    %82 = vector.load %arg9[%c0_36, %c0_37] : memref<3x128xf32, #tpu.memory_space<vmem>>, vector<3x128xf32>
    %cst_38 = arith.constant dense<0.000000e+00> : vector<3x128xf32>
    %83 = vector.multi_reduction <add>, %8, %cst_38 [1] : vector<3x2x128xf32> to vector<3x128xf32>
    %84 = arith.addf %82, %83 : vector<3x128xf32>
    %c0_39 = arith.constant 0 : index
    %c0_40 = arith.constant 0 : index
    %85 = vector.load %arg9[%c0_39, %c0_40] : memref<3x128xf32, #tpu.memory_space<vmem>>, vector<3x128xf32>
    tpu.vector_store %arg9[%c0_39, %c0_40], %84 {strides = array<i32>} : memref<3x128xf32, #tpu.memory_space<vmem>>, vector<3x128xf32>,
    %c1_i32_41 = arith.constant 1 : i32
    %86 = arith.cmpi eq, %1, %c1_i32_41 : i32
    %87 = arith.extui %86 : i1 to i32
    %c0_i32_42 = arith.constant 0 : i32
    %88 = arith.cmpi ne, %87, %c0_i32_42 : i32
    scf.if %88 {
      %c0_43 = arith.constant 0 : index
      %c0_44 = arith.constant 0 : index
      %89 = vector.load %arg7[%c0_43, %c0_44] : memref<3x128xf32, #tpu.memory_space<vmem>>, vector<3x128xf32>
      %cst_45 = arith.constant dense<0.000000e+00> : vector<3xf32>
      %90 = vector.multi_reduction <add>, %89, %cst_45 [1] : vector<3x128xf32> to vector<3xf32>
      %91 = vector.shape_cast %90 : vector<3xf32> to vector<3x1xf32>
      %c0_46 = arith.constant 0 : index
      %c0_47 = arith.constant 0 : index
      %92 = vector.load %arg8[%c0_46, %c0_47] : memref<3x128xf32, #tpu.memory_space<vmem>>, vector<3x128xf32>
      %cst_48 = arith.constant dense<0.000000e+00> : vector<3xf32>
      %93 = vector.multi_reduction <add>, %92, %cst_48 [1] : vector<3x128xf32> to vector<3xf32>
      %94 = vector.shape_cast %93 : vector<3xf32> to vector<3x1xf32>
      %c0_49 = arith.constant 0 : index
      %c0_50 = arith.constant 0 : index
      %95 = vector.load %arg9[%c0_49, %c0_50] : memref<3x128xf32, #tpu.memory_space<vmem>>, vector<3x128xf32>
      %cst_51 = arith.constant dense<0.000000e+00> : vector<3xf32>
      %96 = vector.multi_reduction <add>, %95, %cst_51 [1] : vector<3x128xf32> to vector<3xf32>
      %97 = vector.shape_cast %96 : vector<3xf32> to vector<3x1xf32>
      %98 = arith.subf %94, %91 : vector<3x1xf32>
      %99 = arith.subf %97, %91 : vector<3x1xf32>
      %cst_52 = arith.constant 1.000000e+00 : f32
      %100 = vector.broadcast %cst_52 : f32 to vector<3x1xf32>
      %101 = arith.addf %91, %100 : vector<3x1xf32>
      %cst_53 = arith.constant 0.699999988 : f32
      %102 = vector.broadcast %cst_53 : f32 to vector<3x1xf32>
      %103 = arith.mulf %102, %98 : vector<3x1xf32>
      %104 = arith.addf %91, %103 : vector<3x1xf32>
      %cst_54 = arith.constant 3.000000e-01 : f32
      %105 = vector.broadcast %cst_54 : f32 to vector<3x1xf32>
      %106 = arith.mulf %105, %99 : vector<3x1xf32>
      %107 = arith.addf %104, %106 : vector<3x1xf32>
      %cst_55 = arith.constant 1.000000e+00 : f32
      %108 = vector.broadcast %cst_55 : f32 to vector<3x1xf32>
      %109 = arith.addf %107, %108 : vector<3x1xf32>
      %110 = arith.divf %101, %109 : vector<3x1xf32>
      %cst_56 = arith.constant 1.000000e+00 : f32
      %111 = vector.broadcast %cst_56 : f32 to vector<3x1xf32>
      %112 = arith.subf %111, %110 : vector<3x1xf32>
      %cst_57 = arith.constant 1.33333337 : f32
      %113 = vector.broadcast %cst_57 : f32 to vector<3x1xf32>
      %114 = math.powf %112, %113 : vector<3x1xf32>
      %cst_58 = arith.constant dense<0.000000e+00> : vector<1xf32>
      %115 = vector.multi_reduction <add>, %114, %cst_58 [0] : vector<3x1xf32> to vector<1xf32>
      %116 = vector.shape_cast %115 : vector<1xf32> to vector<1x1xf32>
      %cst_59 = arith.constant 3.000000e+00 : f32
      %117 = vector.broadcast %cst_59 : f32 to vector<1x1xf32>
      %118 = arith.divf %116, %117 : vector<1x1xf32>
      %c0_60 = arith.constant 0 : index
      %c0_61 = arith.constant 0 : index
      %119 = vector.load %arg5[%c0_60, %c0_61] : memref<1x128xf32, #tpu.memory_space<vmem>>, vector<1x128xf32>
      %cst_62 = arith.constant dense<0.000000e+00> : vector<1xf32>
      %120 = vector.multi_reduction <add>, %119, %cst_62 [1] : vector<1x128xf32> to vector<1xf32>
      %121 = vector.shape_cast %120 : vector<1xf32> to vector<1x1xf32>
      %cst_63 = arith.constant 5.120000e+02 : f32
      %122 = vector.broadcast %cst_63 : f32 to vector<1x1xf32>
      %123 = arith.divf %121, %122 : vector<1x1xf32>
      %c0_64 = arith.constant 0 : index
      %c0_65 = arith.constant 0 : index
      %124 = vector.load %arg6[%c0_64, %c0_65] : memref<1x128xf32, #tpu.memory_space<vmem>>, vector<1x128xf32>
      %cst_66 = arith.constant dense<0.000000e+00> : vector<1xf32>
      %125 = vector.multi_reduction <add>, %124, %cst_66 [1] : vector<1x128xf32> to vector<1xf32>
      %126 = vector.shape_cast %125 : vector<1xf32> to vector<1x1xf32>
      %cst_67 = arith.constant 5.120000e+02 : f32
      %127 = vector.broadcast %cst_67 : f32 to vector<1x1xf32>
      %128 = arith.divf %126, %127 : vector<1x1xf32>
      %129 = arith.addf %128, %118 : vector<1x1xf32>
      %130 = arith.addf %129, %123 : vector<1x1xf32>
      %c0_68 = arith.constant 0 : index
      %c0_69 = arith.constant 0 : index
      %131 = vector.load %arg4[%c0_68, %c0_69] : memref<1x1xf32, #tpu.memory_space<vmem>>, vector<1x1xf32>
      tpu.vector_store %arg4[%c0_68, %c0_69], %130 {strides = array<i32>} : memref<1x1xf32, #tpu.memory_space<vmem>>, vector<1x1xf32>,
    } else {
    }
    return
  }
  func.func @transform_0(%arg0: i32, %arg1: i32) -> (i32, i32, i32, i32) {
    %c0_i32 = arith.constant 0 : i32
    %c0_i32_0 = arith.constant 0 : i32
    %c0_i32_1 = arith.constant 0 : i32
    return %arg0, %c0_i32, %arg1, %c0_i32_0 : i32, i32, i32, i32
  }
  func.func @transform_1(%arg0: i32, %arg1: i32) -> (i32, i32, i32, i32) {
    %c0_i32 = arith.constant 0 : i32
    %c0_i32_0 = arith.constant 0 : i32
    %c0_i32_1 = arith.constant 0 : i32
    return %arg0, %c0_i32, %arg1, %c0_i32_0 : i32, i32, i32, i32
  }
  func.func @transform_2(%arg0: i32, %arg1: i32) -> (i32, i32) {
    %c0_i32 = arith.constant 0 : i32
    %c0_i32_0 = arith.constant 0 : i32
    %c0_i32_1 = arith.constant 0 : i32
    return %c0_i32, %c0_i32_0 : i32, i32
  }
}

</mosaic_0001>

<bundles_post_ra>
// kernel: tpu_custom_call.1
= control target key start
LH: loop header
LB: loop body
LE: loop exit
PB: predicated region body
PF: predicated region fallthrough
CT: control target
= control target key end

     0   :  { %7 = vsyncpa [#allocation8], 0  ;;  %s1167_s0 = inlined_call_operand.hbm [shape: f32[2,3,2,128], index: 0, kind: input, shape index: {}]   ;;  %s1168_s1 = inlined_call_operand.hbm [shape: f32[2,3,2,128], index: 1, kind: input, shape index: {}]   ;;  %s1169_s2 = inlined_call_operand.hbm [shape: f32[1,1], index: 2, kind: output, shape index: {}]  }
   0x1   :  { %9 = vsyncpa [#allocation8 + $0x1], 0 }
   0x2   :  { %10 = vsyncpa [#allocation11], 0 }
   0x3   :  { %12 = vsyncpa [#allocation11 + $0x1], 0 }
   0x4   :  { %13 = vsyncpa [#allocation9], 0  ;;  %s872_s9 = smov 0   ;;  %s874_s10 = smov 0  }
   0x5   :  { %s876_s11 = smov 0   ;;  %s878_s12 = smov 0  }
   0x6   :  { %s880_s13 = smov 0   ;;  %s882_s14 = smov 0  }
   0x7 LB: > { %s572_s15 = sadd.s32 4294967295, %s847_s14   ;;  %s31_s16 = sadd.s32 1, %s843_s13  ;;  %s847_s14 = sphi %s882_s14, %s19_s14   ;;  %s843_s13 = sphi %s880_s13, %s1180_s13   ;;  %s839_s12 = sphi %s878_s12, %s1179_s12   ;;  %s835_s11 = sphi %s876_s11, %s1178_s11   ;;  %s831_s10 = sphi %s874_s10, %s1177_s10   ;;  %s827_s9 = sphi %s872_s9, %s1176_s9  }
   0x8   : > { %p33_p0 = scmp.ge.s32.totalorder %s31_s16, 2  ;;  %s40_s17 = sadd.s32 1, %s835_s11 }
   0x9   : > { %p47_p1 = scmp.ne.s32.totalorder %s835_s11, %s831_s10  ;;  %p48_p2 = scmp.eq.s32.totalorder %s847_s14, 0 }
   0xa   : > { %s1182_s16 = smov (%p33_p0, %s31_s16), 0  ;;  %p53_p4 = scmp.ne.s32.totalorder %s831_s10, %s827_s9 }
   0xb   : > { %p49_p3 = por %p48_p2, %p47_p1  ;;  %s35_s18 = ssub.s32 %s843_s13, %s1182_s16 }
   0xc   : > { %p54_p5 = scmp.eq.s32.totalorder %s572_s15, 0  ;;  %p38_p6 = scmp.eq.s32.totalorder %s35_s18, 0 }
   0xd   : > { %p626_p8 = scmp.lt.s32.totalorder %s847_s14, 2  ;;  %s922_s21 = sand.u32 1, %s835_s11  }
   0xe   : > { %p913_p7 = por %p54_p5, %p53_p4  ;;  %s588_s22 = smul.u32 96, %s843_s13 }
   0xf   : > { %s919_s20 = scalar_select %p38_p6, %s835_s11, %s40_s17  }
  0x10   : > { %s1171_s19 = scalar_select %p913_p7, 1, 0 }
  0x11   : > { %s587_s23 = smul.u32 6, %s922_s21  ;;  %s931_s26 = scalar_lea.hbm %s1167_s0, %s588_s22 }
  0x12   : > { %p933_p9 = pnand %p626_p8, %p49_p3  ;;  %s127_s30 = scalar_lea.sflag [#allocation8], %s922_s21 }
  0x13   : > { %s130_s28 = scalar_lea.vmem [#allocation7], %s587_s23  ;;  %s703_s3 = scalar_lea.hbm %s931_s26, 96 }
  0x14   : > { %s138_s29 = sshll.u32 %s130_s28, 4  ;;  %p704_p10 = scmp.ne.s32.totalorder %s931_s26, %s703_s3  ;;  %s939_s29 = int_to_ptr.vmem [resolvable:$true] %s138_s29 }
  0x15   : > { %p705_p11 = pneg %p933_p9  ;;  %s708_s6 = scalar_lea.hbm %s1167_s0, 192 }
  0x16   : > { %p709_p0 = scmp.lt.u32.totalorder %s931_s26, %s1167_s0  ;;  %p710_p1 = scmp.lt.u32.totalorder %s708_s6, %s703_s3 }
  0x17   : > { %p706_p12 = pnand %p705_p11, %p704_p10  ;;  %p712_p3 = scmp.lt.u32.totalorder %s703_s3, %s931_s26 }
  0x18   : > { %p711_p2 = por %p710_p1, %p709_p0 }
  0x19   : > { %p707_p13 = pneg %p706_p12 }
  0x1a   : > { %p713_p4 = por %p712_p3, %p711_p2 }
  0x1c   : > { %p714_p5 = pnand %p713_p4, %p707_p13 }
  0x1e   : > { %717 = shalt.err (!%p714_p5)
}
  0x1f   : > { %s718_s9 = scalar_lea.vmem %s939_s29, 96  ;;  %s849_s17 = smov [#allocation7]  }
  0x20   : > { %p719_p6 = scmp.ne.s32.totalorder %s939_s29, %s718_s9  ;;  %s723_s18 = sshll.u32 %s849_s17, 4  ;;  %s724_s18 = int_to_ptr.vmem [resolvable:$false] %s723_s18 }
  0x21   : > { %s725_s24 = scalar_lea.vmem %s724_s18, 192  ;;  %p726_p12 = scmp.lt.s32.totalorder %s939_s29, %s724_s18 }
  0x22   : > { %p721_p8 = pnand %p719_p6, %p705_p11  ;;  %p727_p0 = scmp.lt.s32.totalorder %s725_s24, %s718_s9 }
  0x24   : > { %p722_p10 = pneg %p721_p8  ;;  %p728_p1 = por %p727_p0, %p726_p12 }
  0x26   : > { %p729_p2 = pnand %p728_p1, %p722_p10 }
  0x28   : > { %732 = shalt.err (!%p729_p2)
}
  0x29   : > { %s850_s25 = smov 32   ;;  %s851_s28 = smov 2  }
  0x2a   : > { %622 = dma.hbm_to_vmem [thread:$0]  (!%p933_p9), %s931_s26, 96, %s939_s29, %s127_s30, %s850_s25, %s850_s25, %s851_s28  }
  0x2b   : > { %p577_p13 = scmp.ge.s32.totalorder %s847_s14, 1  ;;  %p168_p3 = scmp.lt.s32.totalorder %s847_s14, 3 }
  0x2c   : > { %s983_s6 = scalar_lea.hbm %s1168_s1, %s588_s22  ;;  %s152_s7 = scalar_lea.vmem [#allocation10], %s587_s23 }
  0x2d   : > { %p974_p4 = pnand %p577_p13, %p168_p3  ;;  %s160_s8 = sshll.u32 %s152_s7, 4  ;;  %s987_s8 = int_to_ptr.vmem [resolvable:$true] %s160_s8 }
  0x2e   : > { %s149_s26 = scalar_lea.sflag [#allocation11], %s922_s21  ;;  %s733_s29 = scalar_lea.hbm %s983_s6, 96 }
  0x2f   : > { %p734_p5 = scmp.ne.s32.totalorder %s983_s6, %s733_s29  ;;  %s738_s22 = scalar_lea.hbm %s1168_s1, 192 }
  0x30   : > { %p739_p10 = scmp.lt.u32.totalorder %s983_s6, %s1168_s1  ;;  %p740_p12 = scmp.lt.u32.totalorder %s738_s22, %s733_s29 }
  0x31   : > { %p736_p6 = pnand %p734_p5, %p705_p11  ;;  %p742_p1 = scmp.lt.u32.totalorder %s733_s29, %s983_s6 }
  0x32   : > { %p741_p0 = por %p740_p12, %p739_p10 }
  0x33   : > { %p737_p8 = pneg %p736_p6 }
  0x34   : > { %p743_p2 = por %p742_p1, %p741_p0 }
  0x36   : > { %p744_p13 = pnand %p743_p2, %p737_p8 }
  0x38   : > { %747 = shalt.err (!%p744_p13)
}
  0x39   : > { %s748_s23 = scalar_lea.vmem %s987_s8, 96  ;;  %s852_s24 = smov [#allocation10]  }
  0x3a   : > { %p749_p3 = scmp.ne.s32.totalorder %s987_s8, %s748_s23  ;;  %s753_s4 = sshll.u32 %s852_s24, 4  ;;  %s754_s4 = int_to_ptr.vmem [resolvable:$false] %s753_s4 }
  0x3b   : > { %s755_s5 = scalar_lea.vmem %s754_s4, 192  ;;  %p756_p7 = scmp.lt.s32.totalorder %s987_s8, %s754_s4 }
  0x3c   : > { %p751_p5 = pnand %p749_p3, %p705_p11  ;;  %p757_p10 = scmp.lt.s32.totalorder %s755_s5, %s748_s23 }
  0x3e   : > { %p752_p6 = pneg %p751_p5  ;;  %p758_p12 = por %p757_p10, %p756_p7 }
  0x40   : > { %p759_p0 = pnand %p758_p12, %p752_p6 }
  0x42   : > { %762 = shalt.err (!%p759_p0)
}
  0x43   : > { %625 = dma.hbm_to_vmem [thread:$0]  (!%p933_p9), %s983_s6, 96, %s987_s8, %s149_s26, %s850_s25, %s850_s25, %s851_s28  }
  0x44   : > { %172 = sbr.rel (%p974_p4) target bundleno = 409 (0x199), region = 28  ;;  %s174_s7 = sand.u32 (!%p974_p4), 1, %s831_s10  }
  0x45   : > { %s591_s29 = smul.u32 (!%p974_p4), 6, %s174_s7  ;;  %s175_s30 = scalar_lea.sflag (!%p974_p4), [#allocation8], %s174_s7 }
  0x46   : > { %p1174_p7 = scmp.ne.s32.totalorder (!%p974_p4), %s1171_s19, 0 }
  0x47   : > { %s178_s9 = scalar_lea.vmem (!%p974_p4), [#allocation7], %s591_s29 }
  0x4b   : > { %814 = dma.done.wait (%p1174_p7), %s175_s30, 96  }
  0x4c   : > { %816 = vsyncadd (%p1174_p7), %s175_s30, 4294967200  ;;  %s184_s27 = scalar_lea.sflag [#allocation11], %s174_s7  ;;  %s187_s21 = scalar_lea.vmem [#allocation10], %s591_s29 }
  0x4d   : > { %818 = dma.done.wait (%p1174_p7), %s184_s27, 96  }
  0x4e   : > { %820 = vsyncadd (%p1174_p7), %s184_s27, 4294967200  ;;  %p578_p9 = scmp.ne.s32.totalorder %s839_s12, 0 }
  0x4f   : > { %v853_v0 = vmov (!%p578_p9), 0.0  }
  0x50   : > { %212 = sbr.rel (%p578_p9) target bundleno = 87 (0x57), region = 40  ;;  %213 = vst [vmem:[#allocation2] sm:$0x1] (!%p578_p9), %v853_v0  ;;  %214 = vst [vmem:[#allocation3] sm:$0x1] (!%p578_p9), %v853_v0 }
  0x51   : > { %215 = vst [vmem:[#allocation4] sm:$0x7] (!%p578_p9), %v853_v0  ;;  %216 = vst [vmem:[#allocation5] sm:$0x7] (!%p578_p9), %v853_v0 }
  0x52   : > { %217 = vst [vmem:[#allocation6] sm:$0x7] (!%p578_p9), %v853_v0 }
  0x57 PF: > { %v1030_v1 = vld [vmem:[%s178_s9] sm:$0x3]  ;;  %v1032_v2 = vld [vmem:[%s178_s9 + $0x2] sm:$0x3]  ;;  %v1034_v3 = vld [vmem:[%s187_s21] sm:$0x3] }
  0x58   : > { %v1036_v4 = vld [vmem:[%s187_s21 + $0x2] sm:$0x3]  ;;  %vm224_vm0 = vcmp.gt.f32.partialorder %v1030_v1, %v1032_v2  ;;  %vm226_vm1 = vcmp.gt.f32.partialorder %v1032_v2, %v1030_v1  ;;  %vm247_vm2 = vcmask 1041408   ;;  %v1046_v8 = vld [vmem:[%s178_s9 + $0x4] sm:$0x3]  ;;  %v854_v28 = vmov 3  }
  0x59   : > { %v225_v5 = vsel %vm224_vm0, %v1030_v1, 0.0  ;;  %v227_v6 = vsel %vm226_vm1, %v1032_v2, 0.0  ;;  %v270_v7 = vsel %vm247_vm2, %v1034_v3, -inf  ;;  %v271_v10 = vsel %vm247_vm2, %v1036_v4, -inf  ;;  %v1052_v11 = vld [vmem:[%s187_s21 + $0x4] sm:$0x3] }
  0x5a   : > { %v1048_v9 = vadd.f32 %v227_v6, %v225_v5  ;;  %v248_v12 = vsel %vm247_vm2, %v1030_v1, -inf  ;;  %v249_v13 = vsel %vm247_vm2, %v1032_v2, -inf  ;;  %v273_v14 = vmax.f32 %v270_v7, %v271_v10  ;;  %p582_p11 = scmp.ne.s32.totalorder %s839_s12, 1 }
  0x5b   : > { %v250_v15 = vsel %vm247_vm2, %v1046_v8, -inf  ;;  %v251_v16 = vmax.f32 %v248_v12, %v249_v13  ;;  %v272_v17 = vsel %vm247_vm2, %v1052_v11, -inf  ;;  %v396_v22 = vsel %vm247_vm2, %v1034_v3, 0.0 }
  0x5c   : > { %v233_v18 = vand.u32 2147483647, %v1048_v9  ;;  %v274_v20 = vmax.f32 %v273_v14, %v272_v17  ;;  %v403_v23 = vsel %vm247_vm2, %v1036_v4, 0.0  ;;  %v397_v38 = vrot.slane %v396_v22, 4  ;;  %v395_v17 = vld [vmem:[#allocation6] sm:$0x7] }
  0x5d   : > { %v1063_v19 = vmax.f32 %v251_v16, %v250_v15  ;;  %v404_v39 = vrot.slane %v403_v23, 4  ;;  %v410_v40 = vsel %vm247_vm2, %v1052_v11, 0.0  ;;  %vm358_vm10 = vcmask 1041409  }
  0x5e   : > { %v234_v21 = vsub.f32 0.0, %v233_v18  ;;  %vm275_vm3 = vcmp.eq.f32.partialorder %v1034_v3, %v274_v20  ;;  %vm276_vm4 = vcmp.eq.f32.partialorder %v1036_v4, %v274_v20  ;;  %vm277_vm5 = vcmp.eq.f32.partialorder %v1052_v11, %v274_v20 }
  0x5f   : > { %v253_v24 = vsub.f32 %v1030_v1, %v1063_v19  ;;  %v254_v25 = vsub.f32 %v1032_v2, %v1063_v19  ;;  %v255_v26 = vsub.f32 %v1046_v8, %v1063_v19  ;;  %v278_v29 = vsel %vm275_vm3, 0, %v854_v28 }
  0x60   : > { %v235_v27 = vmul.f32 1.442695, %v234_v21  ;;  %v279_v33 = vsel %vm276_vm4, 1, %v854_v28  ;;  %v280_v34 = vsel %vm277_vm5, 2, %v854_v28  ;;  %v281_v35 = vsel %vm247_vm2, %v278_v29, 2147483647 }
  0x61   : > { %v256_v30 = vmul.f32 1.442695, %v253_v24  ;;  %v258_v31 = vmul.f32 1.442695, %v254_v25  ;;  %v260_v32 = vmul.f32 1.442695, %v255_v26  ;;  %v398_v42 = vadd.f32 %v397_v38, %v396_v22 }
  0x62   : > { %683 = vpow2.f32 %v235_v27  ;;  %v282_v36 = vsel %vm247_vm2, %v279_v33, 2147483647  ;;  %v283_v37 = vsel %vm247_vm2, %v280_v34, 2147483647  ;;  %v411_v43 = vrot.slane %v410_v40, 4 }
  0x63   : > { %685 = vpow2.f32 %v256_v30  ;;  %vm284_vm6 = vcmp.lt.s32.totalorder %v281_v35, %v282_v36  ;;  %v405_v44 = vadd.f32 %v404_v39, %v403_v23  ;;  %v399_v45 = vrot.slane %v398_v42, 2 }
  0x64   : > { %687 = vpow2.f32 %v258_v31  ;;  %v285_v41 = vsel %vm284_vm6, %v281_v35, %v282_v36  ;;  %v412_v46 = vadd.f32 %v411_v43, %v410_v40  ;;  %v229_v63 = vadd.f32 %v1036_v4, %v1034_v3 }
  0x65   : > { %689 = vpow2.f32 %v260_v32  ;;  %vm286_vm7 = vcmp.lt.s32.totalorder %v285_v41, %v283_v37  ;;  %v406_v47 = vrot.slane %v405_v44, 2  ;;  %v400_v49 = vadd.f32 %v399_v45, %v398_v42 }
  0x66   : > { %v287_v48 = vsel %vm286_vm7, %v285_v41, %v283_v37  ;;  %v413_v52 = vrot.slane %v412_v46, 2  ;;  %v855_v5 = vmov 0.0   ;;  %vm360_vm11 = vcmask 1042434  }
  0x67   : > { %v407_v50 = vadd.f32 %v406_v47, %v405_v44  ;;  %v401_v51 = vrot.slane %v400_v49, 1  ;;  %vm288_vm8 = vcmp.eq.s32.totalorder %v287_v48, 0  ;;  %vm289_vm9 = vcmp.eq.s32.totalorder %v287_v48, 1 }
  0x68   : > { %v414_v61 = vadd.f32 %v413_v52, %v412_v46  ;;  %v579_v6 = vsel %vm288_vm8, 1.0, %v855_v5  ;;  %v580_v14 = vsel %vm289_vm9, 1.0, %v855_v5  ;;  %vm290_vm12 = vcmp.eq.s32.totalorder %v287_v48, 2 }
  0x69   : > { %v408_v54 = vrot.slane %v407_v50, 1  ;;  %v402_v59 = vadd.f32 %v401_v51, %v400_v49  ;;  %v230_v20 = vmax.f32 %v1048_v9, 0.0  ;;  %v231_v21 = vmul.f32 %v229_v63, %v1048_v9 }
  0x6a   : > { %v415_v13 = vrot.slane %v414_v61, 1  ;;  %v297_v22 = vmul.f32 %v579_v6, %v1030_v1  ;;  %v298_v24 = vmul.f32 %v580_v14, %v1032_v2  ;;  %v581_v27 = vsel %vm290_vm12, 1.0, %v855_v5 }
  0x6b   : > { %v409_v60 = vadd.f32 %v408_v54, %v407_v50  ;;  %v299_v30 = vmul.f32 %v581_v27, %v1046_v8  ;;  %v232_v1 = vsub.f32 %v230_v20, %v231_v21  ;;  %vm430_vm14 = vcmask (!%p582_p11), 1042432  }
  0x6c   : > { %v684_v53 = vpop.eup %683  ;;  %v416_v18 = vadd.f32 %v415_v13, %v414_v61  ;;  %v300_v31 = vsel %vm247_vm2, %v297_v22, 0.0  ;;  %v301_v9 = vsel %vm247_vm2, %v298_v24, 0.0  ;;  %v310_v13 = vld [vmem:[#allocation2] sm:$0x1]  ;;  %vm464_vm15 = vcmask (!%p582_p11), 1040384  }
  0x6d   : > { %v686_v55 = vpop.eup %685  ;;  %v237_v56 = vadd.f32 1.0, %v684_v53  ;;  %v240_v7 = vmul.f32 -0.5, %v684_v53  ;;  %v420_v15 = vsel %vm358_vm10, %v409_v60, %v402_v59  ;;  %v243_v26 = vand.u32 2147483647, %v684_v53 }
  0x6e   : > { %v688_v57 = vpop.eup %687  ;;  %v262_v58 = vsel %vm247_vm2, %v686_v55, 0.0  ;;  %v421_v25 = vsel %vm360_vm11, %v416_v18, %v420_v15  ;;  %v302_v34 = vadd.f32 %v301_v9, %v300_v31  ;;  %v303_v35 = vsel %vm247_vm2, %v299_v30, 0.0 }
  0x6f   : > { %v690_v62 = vpop.eup %689  ;;  %691 = vlog2.f32 %v237_v56  ;;  %v263_v0 = vsel %vm247_vm2, %v688_v57, 0.0  ;;  %v241_v23 = vadd.f32 1.0, %v240_v7  ;;  %v423_v28 = vadd.f32 %v421_v25, %v395_v17 }
  0x70   : > { %v264_v10 = vadd.f32 %v263_v0, %v262_v58  ;;  %v265_v12 = vsel %vm247_vm2, %v690_v62, 0.0  ;;  %vm244_vm13 = vcmp.lt.f32.partialorder %v243_v26, 0.0004427343  ;;  %v304_v41 = vadd.f32 %v303_v35, %v302_v34  ;;  %v320_v35 = vld [vmem:[#allocation3] sm:$0x1] }
  0x71   : > { %424 = vst [vmem:[#allocation6] sm:$0x7] %v423_v28  ;;  %v242_v29 = vmul.f32 %v684_v53, %v241_v23  ;;  %vm477_vm5 = vcmask (!%p582_p11), 0  }
  0x72   : > { %v266_v16 = vadd.f32 %v265_v12, %v264_v10 }
  0x74   : > { %693 = vlog2.f32 %v266_v16 }
  0x75   : > { %695 = vrcp.f32 %v266_v16 }
  0x79   : > { %v692_v32 = vpop.eup %691 }
  0x7a   : > { %v239_v33 = vmul.f32 0.6931472, %v692_v32 }
  0x7c   : > { %v245_v2 = vsel %vm244_vm13, %v242_v29, %v239_v33 }
  0x7d   : > { %v246_v36 = vadd.f32 %v245_v2, %v232_v1 }
  0x7e   : > { %v694_v37 = vpop.eup %693 }
  0x7f   : > { %v696_v38 = vpop.eup %695  ;;  %v311_v39 = vsel %vm247_vm2, %v246_v36, 0.0  ;;  %v268_v40 = vmul.f32 0.6931472, %v694_v37 }
  0x80   : > { %v312_v8 = vrot.slane %v311_v39, 4  ;;  %v307_v42 = vmul.f32 %v696_v38, %v686_v55  ;;  %v308_v43 = vmul.f32 %v696_v38, %v688_v57  ;;  %v309_v44 = vmul.f32 %v696_v38, %v690_v62 }
  0x81   : > { %v269_v45 = vadd.f32 %v268_v40, %v1063_v19 }
  0x82   : > { %v313_v46 = vadd.f32 %v312_v8, %v311_v39  ;;  %v331_v47 = vmul.f32 %v307_v42, %v1034_v3  ;;  %v332_v48 = vmul.f32 %v308_v43, %v1036_v4  ;;  %v333_v49 = vmul.f32 %v309_v44, %v1052_v11 }
  0x83   : > { %v305_v50 = vsub.f32 %v269_v45, %v304_v41  ;;  %v366_v51 = vsel %vm247_vm2, %v307_v42, 0.0  ;;  %v373_v52 = vsel %vm247_vm2, %v308_v43, 0.0  ;;  %v380_v53 = vsel %vm247_vm2, %v309_v44, 0.0  ;;  %v330_v41 = vld [vmem:[#allocation4] sm:$0x7] }
  0x84   : > { %v314_v54 = vrot.slane %v313_v46, 2  ;;  %v334_v55 = vsel %vm247_vm2, %v331_v47, 0.0  ;;  %v341_v56 = vsel %vm247_vm2, %v332_v48, 0.0  ;;  %v348_v19 = vsel %vm247_vm2, %v333_v49, 0.0  ;;  %v365_v44 = vld [vmem:[#allocation5] sm:$0x7] }
  0x85   : > { %v321_v3 = vsel %vm247_vm2, %v305_v50, 0.0  ;;  %v335_v57 = vrot.slane %v334_v55, 4  ;;  %v342_v4 = vrot.slane %v341_v56, 4  ;;  %v349_v58 = vrot.slane %v348_v19, 4 }
  0x86   : > { %v315_v11 = vadd.f32 %v314_v54, %v313_v46  ;;  %v322_v59 = vrot.slane %v321_v3, 4  ;;  %v367_v60 = vrot.slane %v366_v51, 4  ;;  %v374_v61 = vrot.slane %v373_v52, 4 }
  0x87   : > { %v336_v62 = vadd.f32 %v335_v57, %v334_v55  ;;  %v343_v63 = vadd.f32 %v342_v4, %v341_v56  ;;  %v350_v0 = vadd.f32 %v349_v58, %v348_v19  ;;  %v381_v5 = vrot.slane %v380_v53, 4 }
  0x88   : > { %v316_v6 = vrot.slane %v315_v11, 1  ;;  %v323_v7 = vadd.f32 %v322_v59, %v321_v3  ;;  %v368_v10 = vadd.f32 %v367_v60, %v366_v51  ;;  %v375_v12 = vadd.f32 %v374_v61, %v373_v52  ;;  %v438_v52 = vld [vmem:[#allocation6] sm:$0x7] (!%p582_p11) }
  0x89   : > { %v337_v14 = vrot.slane %v336_v62, 2  ;;  %v344_v15 = vrot.slane %v343_v63, 2  ;;  %v351_v16 = vrot.slane %v350_v0, 2  ;;  %v382_v17 = vadd.f32 %v381_v5, %v380_v53 }
  0x8a   : > { %v317_v18 = vadd.f32 %v316_v6, %v315_v11  ;;  %v324_v20 = vrot.slane %v323_v7, 2  ;;  %v369_v21 = vrot.slane %v368_v10, 2  ;;  %v376_v22 = vrot.slane %v375_v12, 2 }
  0x8b   : > { %v338_v23 = vadd.f32 %v337_v14, %v336_v62  ;;  %v345_v24 = vadd.f32 %v344_v15, %v343_v63  ;;  %v352_v25 = vadd.f32 %v351_v16, %v350_v0  ;;  %v383_v26 = vrot.slane %v382_v17, 2 }
  0x8c   : > { %v318_v27 = vadd.f32 %v317_v18, %v310_v13  ;;  %v325_v28 = vadd.f32 %v324_v20, %v323_v7  ;;  %v370_v29 = vadd.f32 %v369_v21, %v368_v10  ;;  %v377_v30 = vadd.f32 %v376_v22, %v375_v12 }
  0x8d   : > { %v339_v31 = vrot.slane %v338_v23, 1  ;;  %v346_v9 = vrot.slane %v345_v24, 1  ;;  %v353_v32 = vrot.slane %v352_v25, 1  ;;  %v384_v1 = vadd.f32 %v383_v26, %v382_v17 }
  0x8e   : > { %319 = vst [vmem:[#allocation2] sm:$0x1] %v318_v27  ;;  %v326_v33 = vrot.slane %v325_v28, 1  ;;  %v371_v34 = vrot.slane %v370_v29, 1  ;;  %v378_v2 = vrot.slane %v377_v30, 1  ;;  %v439_v54 = vsel (!%p582_p11), %vm430_vm14, %v438_v52, 0.0 }
  0x8f   : > { %v340_v36 = vadd.f32 %v339_v31, %v338_v23  ;;  %v347_v37 = vadd.f32 %v346_v9, %v345_v24  ;;  %v354_v38 = vadd.f32 %v353_v32, %v352_v25  ;;  %v385_v39 = vrot.slane %v384_v1, 1  ;;  %440 = vadd.xlane.f32.xlu1 (!%p582_p11), %v439_v54 }
  0x90   : > { %v327_v40 = vadd.f32 %v326_v33, %v325_v28  ;;  %v372_v8 = vadd.f32 %v371_v34, %v370_v29  ;;  %v379_v42 = vadd.f32 %v378_v2, %v377_v30  ;;  %428 = sbr.rel (%p582_p11) target bundleno = 384 (0x180), region = 44 }
  0x91   : > { %v359_v43 = vsel %vm358_vm10, %v347_v37, %v340_v36  ;;  %v386_v45 = vadd.f32 %v385_v39, %v384_v1 }
  0x92   : > { %v328_v46 = vadd.f32 %v327_v40, %v320_v35  ;;  %v361_v47 = vsel %vm360_vm11, %v354_v38, %v359_v43  ;;  %v390_v48 = vsel %vm358_vm10, %v379_v42, %v372_v8 }
  0x93   : > { %v363_v49 = vadd.f32 %v361_v47, %v330_v41  ;;  %v391_v50 = vsel %vm360_vm11, %v386_v45, %v390_v48 }
  0x94   : > { %329 = vst [vmem:[#allocation3] sm:$0x1] %v328_v46  ;;  %v393_v51 = vadd.f32 %v391_v50, %v365_v44 }
  0x95   : > { %364 = vst [vmem:[#allocation4] sm:$0x7] %v363_v49  ;;  %v463_v4 = vld [vmem:[#allocation2] sm:$0x1] (!%p582_p11) }
  0x96   : > { %394 = vst [vmem:[#allocation5] sm:$0x7] %v393_v51  ;;  %v465_v58 = vsel (!%p582_p11), %vm464_vm15, %v463_v4, 0.0 }
  0x9b   : > { %v470_v19 = vld [vmem:[#allocation3] sm:$0x1] }
  0x9c   : > { %v429_v53 = vld [vmem:[#allocation4] sm:$0x7]  ;;  %v471_v57 = vsel %vm464_vm15, %v470_v19, 0.0 }
  0x9d   : > { %v431_v55 = vsel %vm430_vm14, %v429_v53, 0.0  ;;  %v434_v56 = vld [vmem:[#allocation5] sm:$0x7]  ;;  %472 = vadd.xlane.f32.xlu1 %v471_v57 }
  0x9e   : > { %432 = vadd.xlane.f32.xlu0 %v431_v55  ;;  %v435_v3 = vsel %vm430_vm14, %v434_v56, 0.0 }
  0xa2   : > { %436 = vadd.xlane.f32.xlu0 %v435_v3 }
  0xa6   : > { %466 = vadd.xlane.f32.xlu0 %v465_v58 }
 0x11c   : > { %v441_v59 = vpop.xlane.xlu1 %440 }
 0x12a   : > { %v473_v32 = vpop.xlane.xlu1 %472 }
 0x12b   : > { %v433_v11 = vpop.xlane.xlu0 %432  ;;  %v474_v2 = vmul.f32 0.001953125, %v473_v32 }
 0x12c   : > { %v443_v61 = vsub.f32 %v441_v59, %v433_v11  ;;  %v444_v10 = vadd.f32 1.0, %v433_v11 }
 0x12e   : > { %v447_v0 = vmul.f32 0.3, %v443_v61 }
 0x12f   : > { %v437_v60 = vpop.xlane.xlu0 %436 }
 0x130   : > { %v442_v62 = vsub.f32 %v437_v60, %v433_v11 }
 0x132   : > { %v445_v63 = vmul.f32 0.7, %v442_v62 }
 0x133   : > { %v467_v33 = vpop.xlane.xlu0 %466 }
 0x134   : > { %v446_v5 = vadd.f32 %v445_v63, %v433_v11  ;;  %v469_v36 = vmul.f32 0.001953125, %v467_v33 }
 0x136   : > { %v448_v6 = vadd.f32 %v447_v0, %v446_v5 }
 0x138   : > { %v449_v7 = vadd.f32 1.0, %v448_v6 }
 0x13a   : > { %697 = vrcp.f32 %v449_v7 }
 0x144   : > { %v698_v12 = vpop.eup %697 }
 0x145   : > { %v451_v13 = vmul.f32 %v698_v12, %v444_v10 }
 0x147   : > { %v452_v14 = vsub.f32 1.0, %v451_v13 }
 0x149   : > { %v594_v15 = vand.u32 2147483647, %v452_v14  ;;  %v598_v18 = vand.u32 2147483648, %v452_v14  ;;  %vm593_vm2 = vcmp.lt.f32.partialorder %v452_v14, 0.0  ;;  %vm592_vm3 = vcmp.eq.f32.partialorder %v452_v14, 0.0 }
 0x14b   : > { %699 = vlog2.f32 %v594_v15  ;;  %vm602_vm0 = vweird.f32 %v594_v15  ;;  %vm604_vm1 = vcmp.eq.f32.partialorder %v594_v15, 0.0  ;;  %vm595_vm4 = vcmp.eq.f32.partialorder %v594_v15, inf }
 0x155   : > { %v700_v16 = vpop.eup %699 }
 0x156   : > { %v599_v17 = vmul.f32 0.33333334, %v700_v16 }
 0x158   : > { %701 = vpow2.f32 %v599_v17 }
 0x162   : > { %v702_v20 = vpop.eup %701 }
 0x163   : > { %v601_v21 = vor.u32 %v702_v20, %v598_v18 }
 0x165   : > { %v603_v22 = vsel %vm602_vm0, %v452_v14, %v601_v21 }
 0x166   : > { %v606_v23 = vsel %vm604_vm1, %v598_v18, %v603_v22 }
 0x167   : > { %v607_v24 = vmul.f32 %v606_v23, %v452_v14 }
 0x169   : > { %v608_v25 = vsel %vm593_vm2, nan, %v607_v24 }
 0x16a   : > { %v609_v26 = vsel %vm592_vm3, 0.0, %v608_v25 }
 0x16b   : > { %v610_v27 = vsel %vm595_vm4, inf, %v609_v26 }
 0x16c   : > { %v454_v28 = vsel %vm430_vm14, %v610_v27, 0.0 }
 0x16d   : > { %v455_v29 = vrot.slane %v454_v28, 4 }
 0x16f   : > { %v456_v30 = vadd.f32 %v455_v29, %v454_v28 }
 0x171   : > { %v457_v31 = vrot.slane %v456_v30, 2 }
 0x173   : > { %v458_v9 = vadd.f32 %v457_v31, %v456_v30 }
 0x175   : > { %v459_v1 = vrot.slane %v458_v9, 1 }
 0x177   : > { %v460_v34 = vadd.f32 %v459_v1, %v458_v9 }
 0x179   : > { %v462_v35 = vmul.f32 0.33333334, %v460_v34 }
 0x17b   : > { %v475_v37 = vadd.f32 %v474_v2, %v462_v35 }
 0x17d   : > { %v476_v38 = vadd.f32 %v475_v37, %v469_v36 }
 0x17f   : > { %478 = vst.msk [vmem:[#allocation12] sm:$0x1] %vm477_vm5, %v476_v38 }
 0x180 PF: > { %p1123_p4 = scmp.eq.s32.totalorder %s572_s15, 1  ;;  %s856_s19 = smov [#allocation12]  }
 0x181   : > { %s486_s25 = sshll.u32 %s856_s19, 4  ;;  %s487_s25 = int_to_ptr.vmem [resolvable:$true] %s486_s25 }
 0x182   : > { %s763_s28 = scalar_lea.vmem %s487_s25, 16  ;;  %s769_s3 = scalar_lea.vmem %s487_s25, 32 }
 0x183   : > { %p764_p8 = scmp.ne.s32.totalorder %s487_s25, %s763_s28  ;;  %p770_p13 = scmp.lt.s32.totalorder %s487_s25, %s487_s25 }
 0x184   : > { %p771_p3 = scmp.lt.s32.totalorder %s769_s3, %s763_s28 }
 0x185   : > { %p765_p1 = pnand %p764_p8, %p1123_p4 }
 0x186   : > { %p772_p5 = por %p771_p3, %p770_p13 }
 0x187   : > { %p766_p2 = pneg %p765_p1 }
 0x189   : > { %p773_p6 = pnand %p772_p5, %p766_p2 }
 0x18b   : > { %776 = shalt.err (!%p773_p6)
}
 0x18c   : > { %s777_s8 = scalar_lea.hbm %s1169_s2, 16 }
 0x18d   : > { %p778_p10 = scmp.ne.s32.totalorder %s1169_s2, %s777_s8  ;;  %p783_p7 = scmp.lt.u32.totalorder %s777_s8, %s1169_s2 }
 0x18f   : > { %p779_p12 = pnand %p778_p10, %p1123_p4 }
 0x191   : > { %p780_p0 = pneg %p779_p12 }
 0x193   : > { %p785_p9 = pnand %p783_p7, %p780_p0 }
 0x195   : > { %788 = shalt.err (!%p785_p9)
}
 0x196   : > { %616 = dma.vmem_to_hbm [thread:$0]  (%p1123_p4), %s487_s25, 16, %s1169_s2, [#allocation9]  }
 0x197   : > { %822 = dma.done.wait (%p1123_p4), [#allocation9], 16  }
 0x198   : > { %824 = vsyncadd (%p1123_p4), [#allocation9], 4294967280 }
 0x199 PF: > { %s19_s14 = sadd.s32 1, %s847_s14   ;;  %s1176_s9 = smov %s831_s10 }
 0x19a   : > { %p16_p11 = scmp.ge.s32.totalorder %s19_s14, 4   ;;  %s1177_s10 = smov %s835_s11 }
 0x19b   : > { %s1178_s11 = smov %s919_s20  ;;  %s1179_s12 = smov %s843_s13 }
 0x19c   : > { %s1180_s13 = smov %s1182_s16  ;;  %18 = sbr.rel (!%p16_p11) target bundleno = 7 (0x7), region = 86 }
 0x1a3   :  { %499 = vsyncpa [#allocation8], 1 }
 0x1a4   :  { %501 = vsyncpa [#allocation8 + $0x1], 1 }
 0x1a5   :  { %502 = vsyncpa [#allocation11], 1 }
 0x1a6   :  { %504 = vsyncpa [#allocation11 + $0x1], 1 }
 0x1a7   :  { %505 = vsyncpa [#allocation9], 1 }
 0x1a8   :  { %507 = vsyncpa [#allocation9 + $0x1], 1 }

</bundles_post_ra>
